<compile_context>
chip_gen: v7x
topology: tpu7x:2x2x1
jax: 0.10.0
libtpu: 0.0.40
codegen_flags: <defaults>
</compile_context>

<pallas_src>
import math

import jax
import jax.numpy as jnp
from jax.experimental import pallas as pl
from jax.experimental.pallas import tpu as pltpu


# --- exact GELU via Abramowitz & Stegun 7.1.26 erf approximation ------------
_ERF_P = 0.3275911
_ERF_A1 = 0.254829592
_ERF_A2 = -0.284496736
_ERF_A3 = 1.421413741
_ERF_A4 = -1.453152027
_ERF_A5 = 1.061405429
_INV_SQRT2 = 0.7071067811865476


def _erf(x):
    ax = jnp.abs(x)
    d = 1.0 + _ERF_P * ax
    # Approx reciprocal runs on the (otherwise idle) EUP slot; one Newton
    # step restores ~f32 accuracy so numeric parity is preserved.
    t = pl.reciprocal(d, approx=True)
    t = t * (2.0 - d * t)
    poly = ((((_ERF_A5 * t + _ERF_A4) * t + _ERF_A3) * t + _ERF_A2) * t
            + _ERF_A1) * t
    y = 1.0 - poly * jnp.exp(-ax * ax)
    return jnp.where(x < 0.0, -y, y)


def _gelu_exact(x):
    return 0.5 * x * (1.0 + _erf(x * _INV_SQRT2))


# --- kernel ------------------------------------------------------------------
def _fsc_kernel(x_ref, wp_ref, bp_ref, wg_ref, bg_ref, out_ref):
    # x_ref: (TM, K) native dtype | wp_ref: (K, P) | bp_ref: (1, P)
    # wg_ref: (K, G) | bg_ref: (1, G) | out_ref: (TM, 2P+G)
    x = x_ref[...]                     # no upcast: MXU consumes native dtype
    p_dim = wp_ref.shape[1]

    # frequency branch: p = x @ W_p + b_p  (f32 accumulation on the MXU)
    p = jnp.dot(x, wp_ref[...], preferred_element_type=jnp.float32)
    p = p + bp_ref[...].astype(jnp.float32)
    out_ref[:, :p_dim] = jnp.cos(p).astype(out_ref.dtype)
    out_ref[:, p_dim:2 * p_dim] = jnp.sin(p).astype(out_ref.dtype)

    # gated branch: g = gelu(x @ W_g + b_g), elementwise math stays f32
    g = jnp.dot(x, wg_ref[...], preferred_element_type=jnp.float32)
    g = g + bg_ref[...].astype(jnp.float32)
    out_ref[:, 2 * p_dim:] = _gelu_exact(g).astype(out_ref.dtype)


# --- wrapper -----------------------------------------------------------------
def _round_up(x, m):
    return ((x + m - 1) // m) * m


def fsc_layer(src, w_p, b_p, w_g, b_g, *, block_m=512, compute_dtype=None,
              vmem_budget_bytes=40 * 1024 * 1024):
    """src: (..., K); w_p: (K, P); b_p: (P,); w_g: (K, G); b_g: (G,).
    Returns (..., 2*P + G) = [cos(p), sin(p), gelu(g)] (FscLayer.forward).

    compute_dtype: optionally cast activations/weights (e.g. jnp.bfloat16)
    for MXU-peak matmuls; accumulation stays f32, output keeps src.dtype.
    """
    K = src.shape[-1]
    P = w_p.shape[1]
    G = w_g.shape[1]
    N = 2 * P + G

    lead = src.shape[:-1]
    M = math.prod(lead) if lead else 1
    x2 = src.reshape(M, K)

    if compute_dtype is not None:
        x2 = x2.astype(compute_dtype)
        w_p = w_p.astype(compute_dtype)
        w_g = w_g.astype(compute_dtype)
    bp2 = b_p.reshape(1, P)
    bg2 = b_g.reshape(1, G)

    x_bytes = x2.dtype.itemsize
    w_bytes = w_p.dtype.itemsize
    b_bytes = bp2.dtype.itemsize
    out_bytes = src.dtype.itemsize

    def vmem_est(tm_):
        # every operand gets double-buffered by the Pallas pipeline
        x_tile = tm_ * K * x_bytes
        o_tile = tm_ * N * out_bytes
        resident = K * (P + G) * w_bytes + (P + G) * b_bytes
        return 2 * (x_tile + o_tile + resident)

    # row tile: multiple of 8 sublanes; keep >= 2 tiles when possible so both
    # v7x TensorCores get work; shrink to fit the (v5e/v6e/v7x-safe) VMEM budget.
    # NOTE: the K x (P+G) weight is held VMEM-resident; for very large K*(P+G)
    # add a K grid axis ("arbitrary") with an f32 accumulator instead.
    tm = min(block_m, _round_up(M, 8))
    if M > 8 and pl.cdiv(M, tm) < 2:
        tm = _round_up(pl.cdiv(M, 2), 8)
    while vmem_est(tm) > vmem_budget_bytes and tm > 8:
        tm = max(8, _round_up(tm // 2, 8))

    vmem_limit = int(min(64 * 1024 * 1024,
                         max(vmem_est(tm) + (4 << 20), 16 << 20)))

    grid = (pl.cdiv(M, tm),)   # ragged last row-tile handled by Pallas (no pad/slice)

    cost = pl.CostEstimate(
        flops=2 * M * K * (P + G),
        transcendentals=M * 2 * (P + G),
        bytes_accessed=(M * K * x_bytes + K * (P + G) * w_bytes
                        + (P + G) * b_bytes + M * N * out_bytes),
    )

    out = pl.pallas_call(
        _fsc_kernel,
        out_shape=jax.ShapeDtypeStruct((M, N), src.dtype),
        grid_spec=pltpu.PrefetchScalarGridSpec(
            num_scalar_prefetch=0,
            grid=grid,
            in_specs=[
                pl.BlockSpec((tm, K), lambda i: (i, 0)),   # activations (row-tiled)
                pl.BlockSpec((K, P), lambda i: (0, 0)),    # W_p (VMEM-resident)
                pl.BlockSpec((1, P), lambda i: (0, 0)),    # b_p
                pl.BlockSpec((K, G), lambda i: (0, 0)),    # W_g (VMEM-resident)
                pl.BlockSpec((1, G), lambda i: (0, 0)),    # b_g
            ],
            out_specs=pl.BlockSpec((tm, N), lambda i: (i, 0)),
        ),
        compiler_params=pltpu.CompilerParams(
            dimension_semantics=("parallel",),
            vmem_limit_bytes=vmem_limit,
        ),
        cost_estimate=cost,
    )(x2, w_p, bp2, w_g, bg2)

    return out.reshape(*lead, N)


# --- test --------------------------------------------------------------------
if __name__ == "__main__":
    key = jax.random.PRNGKey(0)
    k1, k2, k3, k4, k5 = jax.random.split(key, 5)

    B, S, K = 2, 8, 32                 # batch, seq, input_dim
    output_dim, p_ratio = 32, 0.25
    P = int(output_dim * p_ratio)      # 8
    G = output_dim - 2 * P             # 16

    src = jax.random.normal(k1, (B, S, K), dtype=jnp.float32)
    w_p = 0.1 * jax.random.normal(k2, (K, P), dtype=jnp.float32)
    b_p = 0.1 * jax.random.normal(k3, (P,), dtype=jnp.float32)
    w_g = 0.1 * jax.random.normal(k4, (K, G), dtype=jnp.float32)
    b_g = 0.1 * jax.random.normal(k5, (G,), dtype=jnp.float32)

    # pure-JAX reference: exact erf GELU (same as torch F.gelu default)
    p_ref = src @ w_p + b_p
    g_ref = jax.nn.gelu(src @ w_g + b_g, approximate=False)
    ref = jnp.concatenate([jnp.cos(p_ref), jnp.sin(p_ref), g_ref], axis=-1)

    # f32 path: native-dtype matmul, strict parity with the torch module
    out = jax.block_until_ready(fsc_layer(src, w_p, b_p, w_g, b_g))
    assert out.shape == (B, S, output_dim)
    assert jnp.allclose(out, ref, atol=1e-4, rtol=1e-4), "f32 path mismatch"

    # bf16 matmul fast path (opt-in): f32 accumulation, loose tolerance
    out16 = jax.block_until_ready(
        fsc_layer(src, w_p, b_p, w_g, b_g, compute_dtype=jnp.bfloat16))
    assert out16.shape == (B, S, output_dim)
    assert jnp.allclose(out16.astype(jnp.float32), ref, atol=3e-2, rtol=0.0), \
        "bf16 path mismatch"

    print("KERNEL_OK")
</pallas_src>

<mosaic_0001>
module attributes {stable_mosaic.version = 11 : i64} {
  func.func @_fsc_kernel(%arg0: i32, %arg1: memref<8x32xf32, #tpu.memory_space<vmem>>, %arg2: memref<32x8xf32, #tpu.memory_space<vmem>>, %arg3: memref<1x8xf32, #tpu.memory_space<vmem>>, %arg4: memref<32x16xf32, #tpu.memory_space<vmem>>, %arg5: memref<1x16xf32, #tpu.memory_space<vmem>>, %arg6: memref<8x32xf32, #tpu.memory_space<vmem>>) attributes {dimension_semantics = [#tpu.dimension_semantics<parallel>], iteration_bounds = array<i64: 2>, scalar_prefetch = 0 : i64, scratch_operands = 0 : i64, tpu.core_type = #tpu.core_type<tc>, window_params = [{transform_indices = @transform_0, window_bounds = array<i64: 8, 32>}, {pipeline_mode = #tpu.pipeline_mode<synchronous>, transform_indices = @transform_1, window_bounds = array<i64: 32, 8>}, {pipeline_mode = #tpu.pipeline_mode<synchronous>, transform_indices = @transform_2, window_bounds = array<i64: 1, 8>}, {pipeline_mode = #tpu.pipeline_mode<synchronous>, transform_indices = @transform_3, window_bounds = array<i64: 32, 16>}, {pipeline_mode = #tpu.pipeline_mode<synchronous>, transform_indices = @transform_4, window_bounds = array<i64: 1, 16>}, {transform_indices = @transform_5, window_bounds = array<i64: 8, 32>}]} {
    %c0 = arith.constant 0 : index
    %c0_0 = arith.constant 0 : index
    %0 = vector.load %arg1[%c0, %c0_0] : memref<8x32xf32, #tpu.memory_space<vmem>>, vector<8x32xf32>
    %c0_1 = arith.constant 0 : index
    %c0_2 = arith.constant 0 : index
    %1 = vector.load %arg2[%c0_1, %c0_2] : memref<32x8xf32, #tpu.memory_space<vmem>>, vector<32x8xf32>
    %cst = arith.constant dense<0.000000e+00> : vector<8x8xf32>
    %2 = tpu.matmul %0, %1, %cst {dimension_numbers = #tpu.dot_dimension_numbers<[1], [0], [0], [1], [0, 0, 1, 1], [], []>} : vector<8x32xf32>, vector<32x8xf32>, vector<8x8xf32> -> vector<8x8xf32>
    %c0_3 = arith.constant 0 : index
    %c0_4 = arith.constant 0 : index
    %3 = vector.load %arg3[%c0_3, %c0_4] : memref<1x8xf32, #tpu.memory_space<vmem>>, vector<1x8xf32>
    %4 = vector.broadcast %3 : vector<1x8xf32> to vector<8x8xf32>
    %5 = arith.addf %2, %4 : vector<8x8xf32>
    %6 = math.cos %5 : vector<8x8xf32>
    %c0_5 = arith.constant 0 : index
    %c0_6 = arith.constant 0 : index
    %7 = vector.load %arg6[%c0_5, %c0_6] : memref<8x32xf32, #tpu.memory_space<vmem>>, vector<8x8xf32>
    tpu.vector_store %arg6[%c0_5, %c0_6], %6 {strides = array<i32>} : memref<8x32xf32, #tpu.memory_space<vmem>>, vector<8x8xf32>,
    %8 = math.sin %5 : vector<8x8xf32>
    %c0_7 = arith.constant 0 : index
    %c8 = arith.constant 8 : index
    %9 = vector.load %arg6[%c0_7, %c8] : memref<8x32xf32, #tpu.memory_space<vmem>>, vector<8x8xf32>
    tpu.vector_store %arg6[%c0_7, %c8], %8 {strides = array<i32>} : memref<8x32xf32, #tpu.memory_space<vmem>>, vector<8x8xf32>,
    %c0_8 = arith.constant 0 : index
    %c0_9 = arith.constant 0 : index
    %10 = vector.load %arg4[%c0_8, %c0_9] : memref<32x16xf32, #tpu.memory_space<vmem>>, vector<32x16xf32>
    %cst_10 = arith.constant dense<0.000000e+00> : vector<8x16xf32>
    %11 = tpu.matmul %0, %10, %cst_10 {dimension_numbers = #tpu.dot_dimension_numbers<[1], [0], [0], [1], [0, 0, 1, 1], [], []>} : vector<8x32xf32>, vector<32x16xf32>, vector<8x16xf32> -> vector<8x16xf32>
    %c0_11 = arith.constant 0 : index
    %c0_12 = arith.constant 0 : index
    %12 = vector.load %arg5[%c0_11, %c0_12] : memref<1x16xf32, #tpu.memory_space<vmem>>, vector<1x16xf32>
    %13 = vector.broadcast %12 : vector<1x16xf32> to vector<8x16xf32>
    %14 = arith.addf %11, %13 : vector<8x16xf32>
    %cst_13 = arith.constant 5.000000e-01 : f32
    %15 = vector.broadcast %cst_13 : f32 to vector<8x16xf32>
    %16 = arith.mulf %15, %14 : vector<8x16xf32>
    %cst_14 = arith.constant 0.707106769 : f32
    %17 = vector.broadcast %cst_14 : f32 to vector<8x16xf32>
    %18 = arith.mulf %14, %17 : vector<8x16xf32>
    %19 = math.absf %18 : vector<8x16xf32>
    %cst_15 = arith.constant 0.327591091 : f32
    %20 = vector.broadcast %cst_15 : f32 to vector<8x16xf32>
    %21 = arith.mulf %20, %19 : vector<8x16xf32>
    %cst_16 = arith.constant 1.000000e+00 : f32
    %22 = vector.broadcast %cst_16 : f32 to vector<8x16xf32>
    %23 = arith.addf %22, %21 : vector<8x16xf32>
    %24 = tpu.reciprocal %23 {approx = true} : vector<8x16xf32> -> vector<8x16xf32>
    %25 = arith.mulf %23, %24 : vector<8x16xf32>
    %cst_17 = arith.constant 2.000000e+00 : f32
    %26 = vector.broadcast %cst_17 : f32 to vector<8x16xf32>
    %27 = arith.subf %26, %25 : vector<8x16xf32>
    %28 = arith.mulf %24, %27 : vector<8x16xf32>
    %cst_18 = arith.constant 1.06140542 : f32
    %29 = vector.broadcast %cst_18 : f32 to vector<8x16xf32>
    %30 = arith.mulf %29, %28 : vector<8x16xf32>
    %cst_19 = arith.constant -1.45315206 : f32
    %31 = vector.broadcast %cst_19 : f32 to vector<8x16xf32>
    %32 = arith.addf %30, %31 : vector<8x16xf32>
    %33 = arith.mulf %32, %28 : vector<8x16xf32>
    %cst_20 = arith.constant 1.42141378 : f32
    %34 = vector.broadcast %cst_20 : f32 to vector<8x16xf32>
    %35 = arith.addf %33, %34 : vector<8x16xf32>
    %36 = arith.mulf %35, %28 : vector<8x16xf32>
    %cst_21 = arith.constant -0.284496725 : f32
    %37 = vector.broadcast %cst_21 : f32 to vector<8x16xf32>
    %38 = arith.addf %36, %37 : vector<8x16xf32>
    %39 = arith.mulf %38, %28 : vector<8x16xf32>
    %cst_22 = arith.constant 0.254829586 : f32
    %40 = vector.broadcast %cst_22 : f32 to vector<8x16xf32>
    %41 = arith.addf %39, %40 : vector<8x16xf32>
    %42 = arith.mulf %41, %28 : vector<8x16xf32>
    %cst_23 = arith.constant 0.000000e+00 : f32
    %43 = vector.broadcast %cst_23 : f32 to vector<8x16xf32>
    %44 = arith.subf %43, %19 : vector<8x16xf32>
    %45 = arith.mulf %44, %19 : vector<8x16xf32>
    %46 = math.exp %45 : vector<8x16xf32>
    %47 = arith.mulf %42, %46 : vector<8x16xf32>
    %cst_24 = arith.constant 1.000000e+00 : f32
    %48 = vector.broadcast %cst_24 : f32 to vector<8x16xf32>
    %49 = arith.subf %48, %47 : vector<8x16xf32>
    %cst_25 = arith.constant 0.000000e+00 : f32
    %50 = vector.broadcast %cst_25 : f32 to vector<8x16xf32>
    %51 = arith.cmpf olt, %18, %50 : vector<8x16xf32>
    %cst_26 = arith.constant 0.000000e+00 : f32
    %52 = vector.broadcast %cst_26 : f32 to vector<8x16xf32>
    %53 = arith.subf %52, %49 : vector<8x16xf32>
    %54 = arith.select %51, %53, %49 : vector<8x16xi1>, vector<8x16xf32>
    %cst_27 = arith.constant 1.000000e+00 : f32
    %55 = vector.broadcast %cst_27 : f32 to vector<8x16xf32>
    %56 = arith.addf %55, %54 : vector<8x16xf32>
    %57 = arith.mulf %16, %56 : vector<8x16xf32>
    %c0_28 = arith.constant 0 : index
    %c16 = arith.constant 16 : index
    %58 = vector.load %arg6[%c0_28, %c16] : memref<8x32xf32, #tpu.memory_space<vmem>>, vector<8x16xf32>
    tpu.vector_store %arg6[%c0_28, %c16], %57 {strides = array<i32>} : memref<8x32xf32, #tpu.memory_space<vmem>>, vector<8x16xf32>,
    return
  }
  func.func @transform_0(%arg0: i32) -> (i32, i32) {
    %c0_i32 = arith.constant 0 : i32
    %c0_i32_0 = arith.constant 0 : i32
    return %arg0, %c0_i32 : i32, i32
  }
  func.func @transform_1(%arg0: i32) -> (i32, i32) {
    %c0_i32 = arith.constant 0 : i32
    %c0_i32_0 = arith.constant 0 : i32
    %c0_i32_1 = arith.constant 0 : i32
    return %c0_i32, %c0_i32_0 : i32, i32
  }
  func.func @transform_2(%arg0: i32) -> (i32, i32) {
    %c0_i32 = arith.constant 0 : i32
    %c0_i32_0 = arith.constant 0 : i32
    %c0_i32_1 = arith.constant 0 : i32
    return %c0_i32, %c0_i32_0 : i32, i32
  }
  func.func @transform_3(%arg0: i32) -> (i32, i32) {
    %c0_i32 = arith.constant 0 : i32
    %c0_i32_0 = arith.constant 0 : i32
    %c0_i32_1 = arith.constant 0 : i32
    return %c0_i32, %c0_i32_0 : i32, i32
  }
  func.func @transform_4(%arg0: i32) -> (i32, i32) {
    %c0_i32 = arith.constant 0 : i32
    %c0_i32_0 = arith.constant 0 : i32
    %c0_i32_1 = arith.constant 0 : i32
    return %c0_i32, %c0_i32_0 : i32, i32
  }
  func.func @transform_5(%arg0: i32) -> (i32, i32) {
    %c0_i32 = arith.constant 0 : i32
    %c0_i32_0 = arith.constant 0 : i32
    return %arg0, %c0_i32 : i32, i32
  }
}

</mosaic_0001>

<bundles_post_ra>
// kernel: tpu_custom_call.1
= control target key start
LH: loop header
LB: loop body
LE: loop exit
PB: predicated region body
PF: predicated region fallthrough
CT: control target
= control target key end

     0   :  { %10 = vsyncpa [#allocation3], 0  ;;  %s1119_s0 = inlined_call_operand.vmem [shape: f32[16,32], index: 0, kind: input, shape index: {}]   ;;  %s1120_s1 = inlined_call_operand.vmem [shape: f32[32,8], index: 1, kind: input, shape index: {}]   ;;  %s1121_s2 = inlined_call_operand.vmem [shape: f32[1,8], index: 2, kind: input, shape index: {}]   ;;  %s1122_s3 = inlined_call_operand.vmem [shape: f32[32,16], index: 3, kind: input, shape index: {}]   ;;  %s1123_s4 = inlined_call_operand.vmem [shape: f32[1,16], index: 4, kind: input, shape index: {}]   ;;  %s1124_s5 = inlined_call_operand.hbm [shape: f32[16,32], index: 5, kind: output, shape index: {}]  }
   0x1   :  { %12 = vsyncpa [#allocation3 + $0x1], 0  ;;  %s944_s18 = smov 0   ;;  %s946_s19 = smov 0  }
   0x2   :  { %s948_s20 = smov 0   ;;  %s950_s21 = smov 0  }
   0x3 LB: > { %s965_s22 = sadd.s32 4294967295, %s900_s21   ;;  %s710_s23 = sadd.s32 4294967294, %s900_s21   ;;  %s900_s21 = sphi %s950_s21, %s1130_s21   ;;  %s896_s20 = sphi %s948_s20, %s1129_s20   ;;  %s892_s19 = sphi %s946_s19, %s1128_s19   ;;  %s888_s18 = sphi %s944_s18, %s1127_s18  }
   0x4   : > { %s969_s24 = sadd.s32 1, %s900_s21   ;;  %s135_s25 = sadd.s32 1, %s896_s20 }
   0x5   : > { %s132_s26 = ssub.s32 %s900_s21, %s969_s24  ;;  %p145_p0 = scmp.ne.s32.totalorder %s896_s20, %s892_s19 }
   0x6   : > { %p133_p1 = scmp.eq.s32.totalorder %s132_s26, 0  ;;  %p146_p2 = scmp.eq.s32.totalorder %s965_s22, 1 }
   0x7   : > { %p151_p3 = scmp.ne.s32.totalorder %s892_s19, %s888_s18  ;;  %p152_p4 = scmp.eq.s32.totalorder %s710_s23, 1 }
   0x8   : > { %s980_s27 = scalar_select %p133_p1, %s896_s20, %s135_s25  }
   0x9   : > { %p982_p5 = por %p146_p2, %p145_p0  ;;  %p986_p6 = por %p152_p4, %p151_p3 }
   0xa   : > { %p713_p7 = scmp.ge.s32.totalorder %s900_s21, 1  ;;  %p189_p8 = scmp.lt.s32.totalorder %s900_s21, 3 }
   0xc   : > { %p190_p9 = pnand %p713_p7, %p189_p8 }
   0xd   : > { %v221_v0 = vld [vmem:[%s1120_s1] sm:$0xff] (!%p190_p9)  ;;  %v222_v1 = vld [vmem:[%s1120_s1 + $0x8] sm:$0xff] (!%p190_p9)  ;;  %v902_v3 = vmov (!%p190_p9), 0.0|0.0   ;;  %v223_v6 = vld [vmem:[%s1120_s1 + $0x10] sm:$0xff] (!%p190_p9)  ;;  %p216_p10 = scmp.lt.s32.totalorder (!%p190_p9), %s965_s22, 1  ;;  %vm903_vm0 = vmmov (!%p190_p9), 0  }
   0xe   : > { %193 = sbr.rel (%p190_p9) target bundleno = 452 (0x1c4), region = 40  ;;  %v521_v2 = vld [vmem:[%s1122_s3] sm:$0xff] (!%p190_p9)  ;;  %764 = vmatprep.subr.bf16.mxu0 (!%p190_p9), %v902_v3  ;;  %770 = vmatprep.subr.bf16.mxu1 (!%p190_p9), %v902_v3  ;;  %v765_v4 = vpack.c.bf16 (!%p190_p9), %v222_v1, %v221_v0  ;;  %v522_v5 = vld [vmem:[%s1122_s3 + $0x8] sm:$0xff] (!%p190_p9)  ;;  %v224_v7 = vld [vmem:[%s1120_s1 + $0x18] sm:$0xff] (!%p190_p9)  ;;  %v904_v11 = vmov (!%p190_p9), 0.0   ;;  %vm232_vm1 = vcmask (!%p190_p9), 261120  }
   0xf   : > { %v771_v8 = vpack.c.bf16 (!%p190_p9), %v522_v5, %v521_v2  ;;  %v523_v9 = vld [vmem:[%s1122_s3 + $0x10] sm:$0xff] (!%p190_p9)  ;;  %v524_v10 = vld [vmem:[%s1122_s3 + $0x18] sm:$0xff] (!%p190_p9)  ;;  %750 = vmatprep.mubr.msk.f32.mxu0 (!%p190_p9), %vm903_vm0, %v904_v11  ;;  %761 = vmatprep.mubr.msk.f32.mxu1 (!%p190_p9), %vm903_vm0, %v904_v11  ;;  %v768_v12 = vpack.c.bf16 (!%p190_p9), %v224_v7, %v223_v6  ;;  %v716_v15 = vld [vmem:[%s1121_s2] ss:$0 sm:$0xff] (!%p190_p9)  ;;  %v905_v38 = vmov (!%p190_p9), 2102212464  }
  0x10   : > { %766 = vmatpush3.bf16.msra.mxu0 (!%p190_p9), %v765_v4  ;;  %v774_v13 = vpack.c.bf16 (!%p190_p9), %v524_v10, %v523_v9  ;;  %v726_v16 = vld [vmem:[%s1123_s4] ss:$0 sm:$0xff] (!%p190_p9)  ;;  %v906_v40 = vmov (!%p190_p9), 920167782   ;;  %v907_v44 = vmov (!%p190_p9), 1326507024  }
  0x11   : > { %772 = vmatpush3.bf16.msra.mxu1 (!%p190_p9), %v771_v8  ;;  %767 = vmatprep.subr.bf16.mxu0 (!%p190_p9), %v902_v3  ;;  %v908_v46 = vmov (!%p190_p9), 683565275   ;;  %v909_v48 = vmov (!%p190_p9), 2475754826   ;;  %v910_v51 = vmov (!%p190_p9), 2131351028  }
  0x12   : > { %773 = vmatprep.subr.bf16.mxu1 (!%p190_p9), %v902_v3  ;;  %s213_s14 = sand.u32 (!%p190_p9), 1, %s892_s19   ;;  %vm409_vm12 = vcmask (!%p190_p9), 64512   ;;  %s911_s16 = smov (!%p190_p9), 8  }
  0x13   : > { %s714_s15 = sshll.u32 (!%p190_p9), %s213_s14, 3  ;;  %s912_s23 = smov (!%p190_p9), 16  }
  0x14   : > { %769 = vmatpush3.bf16.msra.mxu0 (!%p190_p9), %v768_v12  ;;  %s215_s17 = scalar_lea.vmem (!%p190_p9), [#allocation2], %s714_s15  ;;  %s729_s25 = sshll.u32 (!%p190_p9), %s965_s22, 7 }
  0x15   : > { %s217_s30 = scalar_select %p216_p10, %s965_s22, 1  ;;  %775 = vmatpush3.bf16.msra.mxu1 %v774_v13 }
  0x16   : > { %s651_s26 = sshll.u32 %s215_s17, 4  ;;  %s1075_s7 = scalar_lea.hbm %s1124_s5, %s729_s25  ;;  %s1077_s26 = int_to_ptr.vmem [resolvable:$true] %s651_s26 }
  0x17   : > { %s715_s6 = sshll.u32 %s217_s30, 3  ;;  %s638_s8 = scalar_lea.sflag [#allocation3], %s213_s14 }
  0x18   : > { %s219_s9 = scalar_lea.vmem %s1119_s0, %s715_s6  ;;  %s913_s22 = smov [#allocation2]  }
  0x19   : > { %v220_v14 = vld [vmem:[%s219_s9] sm:$0xff]  ;;  %s838_s9 = scalar_lea.vmem %s1077_s26, 128  ;;  %s842_s10 = sshll.u32 %s913_s22, 4  ;;  %s843_s10 = int_to_ptr.vmem [resolvable:$false] %s842_s10 }
  0x1a   : > { %751 = vmatmul.mubr.msk.f32.vlgmr.msra.gmra.mrb[0].mxu0 %vm232_vm1, %v220_v14  ;;  %762 = vmatmul.mubr.msk.f32.vlgmr.msra.gmra.mrb[0].mxu1 %vm232_vm1, %v220_v14  ;;  %p839_p11 = scmp.ne.s32.totalorder %s1077_s26, %s838_s9  ;;  %s844_s11 = scalar_lea.vmem %s843_s10, 256 }
  0x1b   : > { %p845_p0 = scmp.lt.s32.totalorder %s1077_s26, %s843_s10  ;;  %p846_p1 = scmp.lt.s32.totalorder %s844_s11, %s838_s9 }
  0x1c   : > { %p840_p12 = pnand %p839_p11, %p982_p5 }
  0x1d   : > { %p847_p2 = por %p846_p1, %p845_p0 }
  0x1e   : > { %p841_p13 = pneg %p840_p12 }
  0x20   : > { %p848_p3 = pnand %p847_p2, %p841_p13 }
  0xed   : > { %v302_v17 = vpop.f32.mrb[0].mxu0  ;;  %v598_v19 = vpop.f32.mrb[0].mxu1 }
  0xee   : > { %v1027_v18 = vadd.f32 %v716_v15, %v302_v17  ;;  %v752_v20 = vpop.f32.mrb[1].mxu0  ;;  %v1029_v21 = vadd.f32 %v726_v16, %v598_v19  ;;  %v763_v22 = vpop.f32.mrb[1].mxu1 }
  0xf0   : > { %v309_v23 = vand.u32 2139095040, %v1027_v18  ;;  %v1033_v24 = vmul.f32 0.70710677, %v1029_v21  ;;  %v306_v25 = vand.u32 2147483647, %v1027_v18  ;;  %vm308_vm9 = vcmp.lt.s32.totalorder %v1027_v18, 0 }
  0xf2   : > { %v310_v26 = vshrl.u32 %v309_v23, 23  ;;  %v1037_v27 = vand.u32 2147483647, %v1033_v24  ;;  %v313_v30 = vand.u32 8388607, %v306_v25  ;;  %vm626_vm11 = vcmp.lt.f32.partialorder %v1033_v24, 0.0 }
  0xf3   : > { %vm307_vm10 = vcmp.le.f32.partialorder %v306_v25, 0.7853982 }
  0xf4   : > { %v718_v28 = vadd.s32 4294967169, %v310_v26  ;;  %v605_v29 = vmul.f32 0.3275911, %v1037_v27  ;;  %v314_v34 = vor.u32 8388608, %v313_v30 }
  0xf6   : > { %v316_v31 = vadd.s32 1, %v718_v28  ;;  %v606_v32 = vadd.f32 1.0, %v605_v29  ;;  %v354_v42 = vshll.u32 %v314_v34, 8  ;;  %v620_v34 = vsub.f32 0.0, %v1037_v27 }
  0xf8   : > { %vm317_vm2 = vcmp.gt.s32.totalorder %v316_v31, 0  ;;  %830 = vrcp.f32 %v606_v32 }
  0xf9   : > { %v318_v33 = vsel %vm317_vm2, %v316_v31, 0 }
  0xfa   : > { %v319_v35 = vshrl.u32 %v318_v33, 5  ;;  %v320_v36 = vand.u32 31, %v318_v33 }
  0xfc   : > { %v321_v37 = vsub.s32 32, %v320_v36  ;;  %v332_v39 = vshll.u32 %v905_v38, %v320_v36  ;;  %v335_v41 = vshll.u32 %v906_v40, %v320_v36  ;;  %vm341_vm3 = vcmp.lt.s32.totalorder %v319_v35, 4 }
  0xfd   : > { %v323_v47 = vshll.u32 %v908_v46, %v320_v36  ;;  %v326_v50 = vshll.u32 %v909_v48, %v320_v36  ;;  %v329_v53 = vshll.u32 %v910_v51, %v320_v36  ;;  %vm338_vm4 = vcmp.lt.s32.totalorder %v319_v35, 1 }
  0xfe   : > { %v333_v43 = vshrl.u32 %v906_v40, %v321_v37  ;;  %v336_v45 = vshrl.u32 %v907_v44, %v321_v37  ;;  %v324_v49 = vshrl.u32 %v909_v48, %v321_v37  ;;  %v327_v52 = vshrl.u32 %v910_v51, %v321_v37 }
  0xff   : > { %v330_v54 = vshrl.u32 %v905_v38, %v321_v37  ;;  %v322_v57 = vshrl.u32 %v908_v46, %v321_v37  ;;  %vm339_vm5 = vcmp.lt.s32.totalorder %v319_v35, 2  ;;  %vm340_vm6 = vcmp.lt.s32.totalorder %v319_v35, 3 }
 0x100   : > { %v334_v55 = vor.u32 %v333_v43, %v332_v39  ;;  %v337_v56 = vor.u32 %v336_v45, %v335_v41  ;;  %v325_v58 = vor.u32 %v324_v49, %v323_v47  ;;  %v328_v59 = vor.u32 %v327_v52, %v326_v50 }
 0x101   : > { %v331_v60 = vor.u32 %v330_v54, %v329_v53  ;;  %v621_v38 = vmul.f32 %v620_v34, %v1037_v27 }
 0x102   : > { %v347_v61 = vsel %vm341_vm3, %v334_v55, 920167782  ;;  %v351_v62 = vsel %vm341_vm3, %v337_v56, 1326507024  ;;  %v342_v63 = vsel %vm338_vm4, %v322_v57, %v325_v58  ;;  %v831_v0 = vpop.eup %830  ;;  %v346_v2 = vsel %vm338_vm4, %v325_v58, %v328_v59 }
 0x103   : > { %v343_v1 = vsel %vm341_vm3, %v331_v60, 2102212464  ;;  %v348_v3 = vsel %vm340_vm6, %v331_v60, %v347_v61  ;;  %v350_v4 = vsel %vm338_vm4, %v328_v59, %v331_v60  ;;  %v608_v5 = vmul.f32 %v831_v0, %v606_v32 }
 0x104   : > { %v344_v6 = vsel %vm340_vm6, %v328_v59, %v343_v1  ;;  %v349_v7 = vsel %vm339_vm5, %v346_v2, %v348_v3  ;;  %v352_v8 = vsel %vm340_vm6, %v334_v55, %v351_v62  ;;  %v622_v41 = vmul.f32 1.442695, %v621_v38 }
 0x105   : > { %v353_v9 = vsel %vm339_vm5, %v350_v4, %v352_v8  ;;  %v1047_v10 = vmul.u32.u64.low %v354_v42, %v349_v7  ;;  %v1048_v11 = vmul.u32.u64.high %v354_v42, %v349_v7, %v1047_v10  ;;  %v609_v12 = vsub.f32 2.0, %v608_v5 }
 0x106   : > { %v1050_v13 = vmul.u32.u64.low %v354_v42, %v353_v9  ;;  %v1051_v14 = vmul.u32.u64.high %v354_v42, %v353_v9, %v1050_v13  ;;  %v345_v15 = vsel %vm339_vm5, %v342_v63, %v344_v6  ;;  %832 = vpow2.f32 %v622_v41 }
 0x107   : > { %v610_v16 = vmul.f32 %v831_v0, %v609_v12  ;;  %v364_v17 = vadd.s32 1, %v1048_v11  ;;  %v361_v19 = vmul.u32 %v354_v42, %v345_v15  ;;  %vm398_vm3 = vweird.f32 %v1027_v18 }
 0x108   : > { %vm363_vm7 = vc.u32 %v1051_v14, %v1047_v10  ;;  %v362_v43 = vadd.s32 %v1047_v10, %v1051_v14  ;;  %vm519_vm4 = vcmask 130112   ;;  %vm635_vm5 = vcmask 261248  }
 0x109   : > { %v365_v20 = vsel %vm363_vm7, %v364_v17, %v1048_v11  ;;  %v611_v23 = vmul.f32 1.0614054, %v610_v16 }
 0x10a   : > { %v366_v22 = vadd.s32 %v365_v20, %v361_v19  ;;  %v602_v20 = vmul.f32 0.5, %v1029_v21 }
 0x10b   : > { %v612_v29 = vadd.f32 -1.4531521, %v611_v23 }
 0x10c   : > { %v367_v26 = vadd.s32 536870912, %v366_v22 }
 0x10d   : > { %v613_v32 = vmul.f32 %v612_v29, %v610_v16 }
 0x10e   : > { %v368_v28 = vshrl.u32 %v367_v26, 30 }
 0x10f   : > { %v614_v36 = vadd.f32 1.4214138, %v613_v32 }
 0x110   : > { %v369_v30 = vshll.u32 %v368_v28, 30  ;;  %v392_v57 = vsub.s32 4, %v368_v28  ;;  %v833_v60 = vpop.eup %832 }
 0x111   : > { %v615_v40 = vmul.f32 %v614_v36, %v610_v16 }
 0x112   : > { %v370_v31 = vsub.s32 %v366_v22, %v369_v30  ;;  %v393_v62 = vsel %vm308_vm9, %v392_v57, %v368_v28 }
 0x113   : > { %v616_v46 = vadd.f32 -0.28449672, %v615_v40  ;;  %v395_v1 = vsel %vm307_vm10, 0, %v393_v62 }
 0x114   : > { %v372_v33 = vsub.s32 0, %v370_v31  ;;  %v504_v2 = vadd.s32 3, %v395_v1  ;;  %v399_v4 = vand.u32 3, %v395_v1 }
 0x115   : > { %v617_v52 = vmul.f32 %v616_v46, %v610_v16 }
 0x116   : > { %v719_v35 = vmin.u32 %v372_v33, %v370_v31  ;;  %v505_v5 = vand.u32 3, %v504_v2  ;;  %vm404_vm13 = vcmp.eq.s32.totalorder %v399_v4, 2  ;;  %vm401_vm15 = vcmp.eq.s32.totalorder %v399_v4, 0 }
 0x117   : > { %v618_v55 = vadd.f32 0.2548296, %v617_v52  ;;  %vm400_vm1 = vcmp.lt.s32.totalorder %v399_v4, 2 }
 0x118   : > { %v374_v37 = vclz %v719_v35  ;;  %vm510_vm14 = vcmp.eq.s32.totalorder %v505_v5, 2  ;;  %vm507_vm0 = vcmp.eq.s32.totalorder %v505_v5, 0  ;;  %vm506_vm2 = vcmp.lt.s32.totalorder %v505_v5, 2 }
 0x119   : > { %v619_v59 = vmul.f32 %v618_v55, %v610_v16 }
 0x11a   : > { %v720_v39 = vadd.s32 4294967294, %v374_v37 }
 0x11b   : > { %v624_v0 = vmul.f32 %v833_v60, %v619_v59 }
 0x11c   : > { %vm721_vm8 = vcmp.lt.s32.totalorder %v720_v39, 0 }
 0x11d   : > { %v377_v42 = vsel %vm721_vm8, 0, %v720_v39  ;;  %v625_v3 = vsub.f32 1.0, %v624_v0 }
 0x11e   : > { %v378_v44 = vsub.s32 32, %v377_v42  ;;  %v382_v45 = vsub.s32 4294967266, %v377_v42  ;;  %v379_v47 = vshll.u32 %v370_v31, %v377_v42 }
 0x11f   : > { %v627_v6 = vsub.f32 0.0, %v625_v3 }
 0x120   : > { %v380_v48 = vshrl.u32 %v362_v43, %v378_v44  ;;  %v383_v49 = vadd.s32 127, %v382_v45 }
 0x121   : > { %v628_v10 = vsel %vm626_vm11, %v627_v6, %v625_v3 }
 0x122   : > { %v381_v50 = vor.u32 %v380_v48, %v379_v47  ;;  %v384_v51 = vshll.u32 %v383_v49, 23  ;;  %v629_v16 = vadd.f32 1.0, %v628_v10 }
 0x124   : > { %v385_v53 = vor.u32 4788187, %v384_v51  ;;  %v388_v27 = vcvt.s32.f32 %v381_v50  ;;  %v630_v22 = vmul.f32 %v629_v16, %v602_v20 }
 0x126   : > { %v386_v54 = vand.u32 2147483647, %v385_v53 }
 0x128   : > { %v389_v56 = vmul.f32 %v388_v27, %v386_v54 }
 0x12a   : > { %v390_v58 = vxor.u32 2147483648, %v389_v56 }
 0x12c   : > { %v391_v61 = vsel %vm308_vm9, %v390_v58, %v389_v56 }
 0x12d   : > { %v394_v63 = vsel %vm307_vm10, %v1027_v18, %v391_v61 }
 0x12e   : > { %834 = vcosq.f32 %v394_v63 }
 0x12f   : > { %836 = vsinq.f32 %v394_v63 }
 0x138   : > { %v835_v7 = vpop.eup %834 }
 0x139   : > { %v837_v8 = vpop.eup %836  ;;  %v405_v25 = vxor.u32 2147483648, %v835_v7 }
 0x13a   : > { %v402_v9 = vxor.u32 2147483648, %v837_v8 }
 0x13b   : > { %v512_v11 = vsel %vm510_vm14, %v405_v25, %v837_v8  ;;  %v406_v12 = vsel %vm404_vm13, %v405_v25, %v837_v8 }
 0x13c   : > { %v509_v13 = vsel %vm507_vm0, %v835_v7, %v402_v9  ;;  %v403_v14 = vsel %vm401_vm15, %v835_v7, %v402_v9 }
 0x13d   : > { %v513_v24 = vsel %vm506_vm2, %v509_v13, %v512_v11  ;;  %v407_v15 = vsel %vm400_vm1, %v403_v14, %v406_v12 }
 0x13e   : > { %v514_v17 = vsel %vm398_vm3, nan, %v513_v24  ;;  %v408_v19 = vsel %vm398_vm3, nan, %v407_v15 }
 0x13f   : > { %516 = vrot.lane.b32.xlu0 %v514_v17, %s911_s16  ;;  %410 = vst.msk [vmem:[%s215_s17] sm:$0xff] %vm409_vm12, %v408_v19 }
 0x143   : > { %632 = vrot.lane.b32.xlu0 %v630_v22, %s912_s23 }
 0x1b1   : > { %v517_v18 = vpop.permute.xlu0 %516 }
 0x1b2   : > { %520 = vst.msk [vmem:[%s215_s17] sm:$0xff] %vm519_vm4, %v517_v18 }
 0x1b5   : > { %v633_v21 = vpop.permute.xlu0 %632 }
 0x1b6   : > { %636 = vst.msk [vmem:[%s215_s17] sm:$0xff] %vm635_vm5, %v633_v21 }
 0x1b7   : > { %851 = shalt.err (!%p848_p3)
}
 0x1b8   : > { %s852_s12 = scalar_lea.hbm %s1075_s7, 128  ;;  %s856_s15 = scalar_lea.hbm %s1124_s5, 256 }
 0x1b9   : > { %p853_p4 = scmp.ne.s32.totalorder %s1075_s7, %s852_s12  ;;  %p857_p9 = scmp.lt.u32.totalorder %s1075_s7, %s1124_s5 }
 0x1ba   : > { %p858_p10 = scmp.lt.u32.totalorder %s856_s15, %s852_s12  ;;  %p860_p12 = scmp.lt.u32.totalorder %s852_s12, %s1075_s7 }
 0x1bb   : > { %p854_p7 = pnand %p853_p4, %p982_p5 }
 0x1bc   : > { %p859_p11 = por %p858_p10, %p857_p9 }
 0x1bd   : > { %p855_p8 = pneg %p854_p7 }
 0x1be   : > { %p861_p13 = por %p860_p12, %p859_p11 }
 0x1c0   : > { %p862_p0 = pnand %p861_p13, %p855_p8 }
 0x1c2   : > { %865 = shalt.err (!%p862_p0)
}
 0x1c3   : > { %780 = dma.vmem_to_hbm [thread:$0]  (%p982_p5), %s1077_s26, 128, %s1075_s7, %s638_s8  }
 0x1c4 PF: > { %p786_p1 = scmp.ge.s32.totalorder %s900_s21, 2  ;;  %s663_s23 = sand.u32 1, %s888_s18  }
 0x1c5   : > { %s664_s25 = scalar_lea.sflag [#allocation3], %s663_s23 }
 0x1c6   : > { %p783_p2 = pnand %p786_p1, %p986_p6 }
 0x1c8   : > { %883 = dma.done.wait (!%p783_p2), %s664_s25, 128  }
 0x1c9   : > { %885 = vsyncadd (!%p783_p2), %s664_s25, 4294967168  ;;  %p15_p3 = scmp.ge.s32.totalorder %s969_s24, 4   ;;  %s1127_s18 = smov %s892_s19 }
 0x1ca   : > { %s1128_s19 = smov %s896_s20  ;;  %s1129_s20 = smov %s980_s27 }
 0x1cb   : > { %s1130_s21 = smov %s969_s24  ;;  %17 = sbr.rel (!%p15_p3) target bundleno = 3 (0x3), region = 75 }
 0x1d2   :  { %669 = vsyncpa [#allocation3], 1 }
 0x1d3   :  { %671 = vsyncpa [#allocation3 + $0x1], 1 }

</bundles_post_ra>
